<compile_context>
chip_gen: v7x
topology: tpu7x:2x2x1
jax: 0.10.0
libtpu: 0.0.40
codegen_flags: <defaults>
</compile_context>

<pallas_src>
import math

import jax
import jax.numpy as jnp
from jax.experimental import pallas as pl
from jax.experimental.pallas import tpu as pltpu


_LANE = 128
# Double-buffered per-step working set budget (x tile + out tile + pe tile,
# each x2 for double buffering).  24 MiB keeps headroom under the 32 MiB
# scoped-VMEM limit requested below.
_VMEM_BUDGET_BYTES = 24 << 20
_VMEM_LIMIT_BYTES = 32 << 20


def _build_pe_table(d_model: int, max_len: int = 5000) -> jnp.ndarray:
    """Deterministic sin/cos positional-encoding table, shape [max_len, d_model], f32."""
    position = jnp.arange(max_len, dtype=jnp.float32)[:, None]          # [max_len, 1]
    div_term = jnp.exp(
        jnp.arange(0, d_model, 2, dtype=jnp.float32) * (-math.log(10000.0) / d_model)
    )                                                                    # [d_model/2]
    angles = position * div_term                                         # [max_len, d_model/2]
    pe = jnp.zeros((max_len, d_model), dtype=jnp.float32)
    pe = pe.at[:, 0::2].set(jnp.sin(angles))
    pe = pe.at[:, 1::2].set(jnp.cos(angles))
    return pe


# ---------------------------------------------------------------------------
# Kernels
# ---------------------------------------------------------------------------
def _add_pe_kernel(x_ref, pe_ref, o_ref):
    # x_ref / o_ref: (TILE_S, COLS) in x.dtype (batch dim squeezed by BlockSpec).
    # pe_ref:        (TILE_S, COLS) in f32, reused across the batch axis.
    # Add in f32 (matches the PyTorch f32 pe buffer), store in x.dtype.
    o_ref[...] = (x_ref[...].astype(jnp.float32) + pe_ref[...]).astype(o_ref.dtype)


def _add_pe_kernel_batched(x_ref, pe_ref, o_ref):
    # x_ref / o_ref: (B, ROWS, COLS); pe_ref: (ROWS, COLS) f32, broadcast over batch.
    pe = pe_ref[...][None]  # hoisted single broadcast, kernel body traced once
    o_ref[...] = (x_ref[...].astype(jnp.float32) + pe).astype(o_ref.dtype)


# ---------------------------------------------------------------------------
# Layout / tiling helpers
# ---------------------------------------------------------------------------
def _lane_dense_view(seq_len: int, d_model: int):
    """Return (rows, cols, pad_cols) for a lane-dense 2-D view of one
    (seq, d_model) slab.  pad_cols > 0 => last dim is zero-padded to cols."""
    if d_model % _LANE == 0:
        return seq_len, d_model, 0
    flat = seq_len * d_model
    if flat % _LANE == 0:
        return flat // _LANE, _LANE, 0          # pure reshape, no copy of pad bytes
    padded = pl.cdiv(d_model, _LANE) * _LANE
    return seq_len, padded, padded - d_model    # zero-pad -> unmasked full-lane vst


def _sublane_multiple(itemsize: int) -> int:
    # f32 packs 8 rows / vreg, bf16 16, int8/fp8 32.
    return {4: 8, 2: 16, 1: 32}.get(itemsize, 8)


def _pick_row_tile(rows: int, cols: int, x_itemsize: int, pe_itemsize: int,
                   budget_bytes: int, sub: int) -> int:
    """Largest row tile (multiple of the sublane packing, or the full extent)
    whose double-buffered x/out/pe tiles stay within budget_bytes."""
    bytes_per_row = 2 * cols * (2 * x_itemsize + pe_itemsize)
    max_rows = max(1, budget_bytes // bytes_per_row)
    if max_rows >= rows:
        return rows
    tile = max(sub, (max_rows // sub) * sub)
    return min(tile, rows)


# ---------------------------------------------------------------------------
# Public wrapper
# ---------------------------------------------------------------------------
def positional_encoding(x: jnp.ndarray, pe_table: jnp.ndarray, *,
                        donate_x: bool = False,
                        vmem_budget_bytes: int = _VMEM_BUDGET_BYTES) -> jnp.ndarray:
    """x: [batch, seq, d_model]; pe_table: [max_len, d_model] (f32)."""
    batch, seq_len, d_model = x.shape
    max_len, pe_d = pe_table.shape
    assert pe_d == d_model, "pe_table d_model mismatch"
    assert seq_len <= max_len, "seq_len exceeds positional-encoding table max_len"

    # Glue (pure layout plumbing): static slice, f32 table, lane-dense view.
    pe_slice = pe_table[:seq_len, :].astype(jnp.float32)
    rows, cols, pad = _lane_dense_view(seq_len, d_model)
    if pad:
        x_r = jnp.pad(x, ((0, 0), (0, 0), (0, pad)))
        pe_r = jnp.pad(pe_slice, ((0, 0), (0, pad)))
    else:
        x_r = x.reshape(batch, rows, cols)
        pe_r = pe_slice.reshape(rows, cols)

    x_itemsize = jnp.dtype(x.dtype).itemsize
    pe_itemsize = 4
    sub = _sublane_multiple(x_itemsize)
    io_alias = {0: 0} if donate_x else {}

    # Small-problem path: the entire slab fits the double-buffered budget ->
    # one grid step, batch kept inside the block, pe broadcast in-kernel.
    total_step_bytes = 2 * rows * cols * (2 * batch * x_itemsize + pe_itemsize)
    if total_step_bytes <= vmem_budget_bytes:
        out = pl.pallas_call(
            _add_pe_kernel_batched,
            out_shape=jax.ShapeDtypeStruct((batch, rows, cols), x.dtype),
            grid_spec=pltpu.PrefetchScalarGridSpec(
                num_scalar_prefetch=0,
                grid=(1,),
                in_specs=[
                    pl.BlockSpec((batch, rows, cols), lambda s: (0, 0, 0)),
                    pl.BlockSpec((rows, cols), lambda s: (0, 0)),
                ],
                out_specs=pl.BlockSpec((batch, rows, cols), lambda s: (0, 0, 0)),
            ),
            compiler_params=pltpu.CompilerParams(
                dimension_semantics=("arbitrary",),
                vmem_limit_bytes=_VMEM_LIMIT_BYTES,
            ),
            input_output_aliases=io_alias,
        )(x_r, pe_r)
    else:
        tile_s = _pick_row_tile(rows, cols, x_itemsize, pe_itemsize,
                                vmem_budget_bytes, sub)
        n_seq_tiles = pl.cdiv(rows, tile_s)
        out = pl.pallas_call(
            _add_pe_kernel,
            out_shape=jax.ShapeDtypeStruct((batch, rows, cols), x.dtype),
            grid_spec=pltpu.PrefetchScalarGridSpec(
                num_scalar_prefetch=0,
                # batch innermost (sequential) so the pe tile, whose index_map
                # ignores b, is DMA'd once per seq tile instead of per (s, b).
                grid=(n_seq_tiles, batch),
                in_specs=[
                    pl.BlockSpec((None, tile_s, cols), lambda s, b: (b, s, 0)),
                    pl.BlockSpec((tile_s, cols), lambda s, b: (s, 0)),
                ],
                out_specs=pl.BlockSpec((None, tile_s, cols), lambda s, b: (b, s, 0)),
            ),
            compiler_params=pltpu.CompilerParams(
                # seq tiles shard across v7x's 2 TensorCores; batch stays the
                # innermost sequential loop on each core (preserves pe reuse).
                dimension_semantics=("parallel", "arbitrary"),
                vmem_limit_bytes=_VMEM_LIMIT_BYTES,
            ),
            input_output_aliases=io_alias,
        )(x_r, pe_r)

    if pad:
        return out[:, :, :d_model]
    return out.reshape(batch, seq_len, d_model)


# ---------------------------------------------------------------------------
# Self-test
# ---------------------------------------------------------------------------
if __name__ == "__main__":
    key = jax.random.PRNGKey(0)
    max_len = 5000

    # Case 1: the module's small example shape (d_model=32 -> flatten path,
    # single-block small path).
    batch, seq_len, d_model = 2, 8, 32
    x = jax.random.normal(key, (batch, seq_len, d_model), dtype=jnp.float32)
    pe_table = _build_pe_table(d_model, max_len)
    out = jax.block_until_ready(positional_encoding(x, pe_table))
    ref = x + pe_table[None, :seq_len, :]
    assert out.shape == (batch, seq_len, d_model)
    assert jnp.allclose(out, ref, atol=1e-6), "mismatch vs reference (case 1)"

    # Case 2: lane-dense d_model (d_model % 128 == 0), single-block path.
    b2, s2, d2 = 2, 16, 128
    x2 = jax.random.normal(jax.random.PRNGKey(1), (b2, s2, d2), dtype=jnp.float32)
    pe2 = _build_pe_table(d2, max_len)
    out2 = jax.block_until_ready(positional_encoding(x2, pe2))
    ref2 = x2 + pe2[None, :s2, :]
    assert jnp.allclose(out2, ref2, atol=1e-6), "mismatch vs reference (case 2)"

    # Case 3: awkward shape (seq=7, d_model=100) -> zero-pad path, no masked stores.
    b3, s3, d3 = 2, 7, 100
    x3 = jax.random.normal(jax.random.PRNGKey(2), (b3, s3, d3), dtype=jnp.float32)
    pe3 = _build_pe_table(d3, max_len)
    out3 = jax.block_until_ready(positional_encoding(x3, pe3))
    ref3 = x3 + pe3[None, :s3, :]
    assert out3.shape == (b3, s3, d3)
    assert jnp.allclose(out3, ref3, atol=1e-6), "mismatch vs reference (case 3)"

    # Case 4: bf16 input (f32 accumulation in-kernel, bf16 output).
    b4, s4, d4 = 2, 16, 128
    x4 = jax.random.normal(jax.random.PRNGKey(3), (b4, s4, d4), dtype=jnp.bfloat16)
    pe4 = _build_pe_table(d4, max_len)
    out4 = jax.block_until_ready(positional_encoding(x4, pe4))
    ref4 = (x4.astype(jnp.float32) + pe4[None, :s4, :]).astype(jnp.bfloat16)
    assert jnp.allclose(out4.astype(jnp.float32), ref4.astype(jnp.float32),
                        atol=2e-2), "mismatch vs reference (case 4)"

    # Case 5: force the tiled (seq_tiles, batch) path with a tiny VMEM budget
    # so the ragged-last-tile + squeezed-batch code path is exercised cheaply.
    b5, s5, d5 = 2, 68, 128
    x5 = jax.random.normal(jax.random.PRNGKey(4), (b5, s5, d5), dtype=jnp.float32)
    pe5 = _build_pe_table(d5, max_len)
    out5 = jax.block_until_ready(
        positional_encoding(x5, pe5, vmem_budget_bytes=1 << 14))
    ref5 = x5 + pe5[None, :s5, :]
    assert jnp.allclose(out5, ref5, atol=1e-6), "mismatch vs reference (case 5)"

    print("KERNEL_OK")
</pallas_src>

<mosaic_0001>
module attributes {stable_mosaic.version = 11 : i64} {
  func.func @_add_pe_kernel_batched(%arg0: i32, %arg1: memref<2x2x128xf32, #tpu.memory_space<vmem>>, %arg2: memref<2x128xf32, #tpu.memory_space<vmem>>, %arg3: memref<2x2x128xf32, #tpu.memory_space<vmem>>) attributes {dimension_semantics = [#tpu.dimension_semantics<arbitrary>], iteration_bounds = array<i64: 1>, scalar_prefetch = 0 : i64, scratch_operands = 0 : i64, tpu.core_type = #tpu.core_type<tc>, window_params = [{pipeline_mode = #tpu.pipeline_mode<synchronous>, transform_indices = @transform_0, window_bounds = array<i64: 2, 2, 128>}, {pipeline_mode = #tpu.pipeline_mode<synchronous>, transform_indices = @transform_1, window_bounds = array<i64: 2, 128>}, {pipeline_mode = #tpu.pipeline_mode<synchronous>, transform_indices = @transform_2, window_bounds = array<i64: 2, 2, 128>}]} {
    %c0 = arith.constant 0 : index
    %c0_0 = arith.constant 0 : index
    %0 = vector.load %arg2[%c0, %c0_0] : memref<2x128xf32, #tpu.memory_space<vmem>>, vector<2x128xf32>
    %1 = vector.shape_cast %0 : vector<2x128xf32> to vector<1x2x128xf32>
    %c0_1 = arith.constant 0 : index
    %c0_2 = arith.constant 0 : index
    %c0_3 = arith.constant 0 : index
    %2 = vector.load %arg1[%c0_1, %c0_2, %c0_3] : memref<2x2x128xf32, #tpu.memory_space<vmem>>, vector<2x2x128xf32>
    %3 = vector.broadcast %1 : vector<1x2x128xf32> to vector<2x2x128xf32>
    %4 = arith.addf %2, %3 : vector<2x2x128xf32>
    %c0_4 = arith.constant 0 : index
    %c0_5 = arith.constant 0 : index
    %c0_6 = arith.constant 0 : index
    %5 = vector.load %arg3[%c0_4, %c0_5, %c0_6] : memref<2x2x128xf32, #tpu.memory_space<vmem>>, vector<2x2x128xf32>
    tpu.vector_store %arg3[%c0_4, %c0_5, %c0_6], %4 {strides = array<i32>} : memref<2x2x128xf32, #tpu.memory_space<vmem>>, vector<2x2x128xf32>,
    return
  }
  func.func @transform_0(%arg0: i32) -> (i32, i32, i32) {
    %c0_i32 = arith.constant 0 : i32
    %c0_i32_0 = arith.constant 0 : i32
    %c0_i32_1 = arith.constant 0 : i32
    %c0_i32_2 = arith.constant 0 : i32
    return %c0_i32, %c0_i32_0, %c0_i32_1 : i32, i32, i32
  }
  func.func @transform_1(%arg0: i32) -> (i32, i32) {
    %c0_i32 = arith.constant 0 : i32
    %c0_i32_0 = arith.constant 0 : i32
    %c0_i32_1 = arith.constant 0 : i32
    return %c0_i32, %c0_i32_0 : i32, i32
  }
  func.func @transform_2(%arg0: i32) -> (i32, i32, i32) {
    %c0_i32 = arith.constant 0 : i32
    %c0_i32_0 = arith.constant 0 : i32
    %c0_i32_1 = arith.constant 0 : i32
    %c0_i32_2 = arith.constant 0 : i32
    return %c0_i32, %c0_i32_0, %c0_i32_1 : i32, i32, i32
  }
}

</mosaic_0001>

<bundles_post_ra>
// kernel: tpu_custom_call.1
= control target key start
LH: loop header
LB: loop body
LE: loop exit
PB: predicated region body
PF: predicated region fallthrough
CT: control target
= control target key end

     0   :  { %7 = vsyncpa [#allocation3], 0  ;;  %s154_s0 = inlined_call_operand.hbm [shape: f32[2,2,128], index: 0, kind: input, shape index: {}]   ;;  %s155_s1 = inlined_call_operand.vmem [shape: f32[2,128], index: 1, kind: input, shape index: {}]   ;;  %s156_s2 = inlined_call_operand.hbm [shape: f32[2,2,128], index: 2, kind: output, shape index: {}]  }
   0x1   :  { %8 = vsyncpa [#allocation4], 0  ;;  %s102_s9 = smov [#allocation2]   ;;  %s54_s13 = scalar_lea.hbm %s154_s0, 64 }
   0x2   :  { %s14_s10 = sshll.u32 %s102_s9, 4  ;;  %p55_p0 = scmp.ne.s32.totalorder %s154_s0, %s54_s13  ;;  %s15_s10 = int_to_ptr.vmem [resolvable:$true] %s14_s10 }
   0x3   :  { %p58_p1 = scmp.lt.u32.totalorder %s54_s13, %s154_s0 }
   0x5   :  { %p60_p2 = pnand %p58_p1, %p55_p0 }
   0x7   :  { %63 = shalt.err (!%p60_p2)
}
   0x8   :  { %s64_s18 = scalar_lea.vmem %s15_s10, 64  ;;  %p69_p4 = scmp.lt.s32.totalorder %s15_s10, %s15_s10 }
   0x9   :  { %p65_p3 = scmp.ne.s32.totalorder %s15_s10, %s64_s18  ;;  %p70_p5 = scmp.lt.s32.totalorder %s64_s18, %s64_s18 }
   0xb   :  { %p71_p6 = por %p70_p5, %p69_p4 }
   0xd   :  { %p72_p7 = pnand %p71_p6, %p65_p3 }
   0xf   :  { %75 = shalt.err (!%p72_p7)
}
  0x10   :  { %s103_s19 = smov 32   ;;  %s104_s20 = smov 2  }
  0x11   :  { %20 = dma.hbm_to_vmem [thread:$0]  %s154_s0, 64, %s15_s10, [#allocation3], %s103_s19, %s103_s19, %s104_s20  }
  0x12   :  { %98 = dma.done.wait [#allocation3], 64  }
  0x13   :  { %99 = vsyncadd [#allocation3], 4294967232  ;;  %s105_s23 = smov [#allocation5]   ;;  %v26_v0 = vld [vmem:[%s155_s1] sm:$0x3] }
  0x14   :  { %s38_s24 = sshll.u32 %s105_s23, 4  ;;  %v27_v1 = vld [vmem:[#allocation2] sm:$0x3]  ;;  %v28_v2 = vld [vmem:[#allocation2 + $0x2] sm:$0x3]  ;;  %s39_s24 = int_to_ptr.vmem [resolvable:$true] %s38_s24 }
  0x15   :  { %v29_v3 = vadd.f32 %v27_v1, %v26_v0  ;;  %v30_v4 = vadd.f32 %v28_v2, %v26_v0  ;;  %s76_s27 = scalar_lea.vmem %s39_s24, 64  ;;  %p81_p9 = scmp.lt.s32.totalorder %s39_s24, %s39_s24 }
  0x16   :  { %p77_p8 = scmp.ne.s32.totalorder %s39_s24, %s76_s27  ;;  %p82_p10 = scmp.lt.s32.totalorder %s76_s27, %s76_s27 }
  0x17   :  { %31 = vst [vmem:[#allocation5] sm:$0x3] %v29_v3  ;;  %32 = vst [vmem:[#allocation5 + $0x2] sm:$0x3] %v30_v4 }
  0x18   :  { %p83_p11 = por %p82_p10, %p81_p9 }
  0x1a   :  { %p84_p12 = pnand %p83_p11, %p77_p8 }
  0x1c   :  { %87 = shalt.err (!%p84_p12)
}
  0x1d   :  { %s88_s29 = scalar_lea.hbm %s156_s2, 64 }
  0x1e   :  { %p89_p13 = scmp.ne.s32.totalorder %s156_s2, %s88_s29  ;;  %p92_p0 = scmp.lt.u32.totalorder %s88_s29, %s156_s2 }
  0x20   :  { %p94_p1 = pnand %p92_p0, %p89_p13 }
  0x22   :  { %97 = shalt.err (!%p94_p1)
}
  0x23   :  { %44 = dma.vmem_to_hbm [thread:$0]  %s39_s24, 64, %s156_s2, [#allocation4], %s103_s19, %s103_s19, %s104_s20  }
  0x24   :  { %100 = dma.done.wait [#allocation4], 64  }
  0x25   :  { %101 = vsyncadd [#allocation4], 4294967232 }
  0x26   :  { %48 = vsyncpa [#allocation3], 1 }
  0x27   :  { %49 = vsyncpa [#allocation4], 1 }

</bundles_post_ra>
